<compile_context>
chip_gen: v7x
topology: tpu7x:2x2x1
jax: 0.10.0
libtpu: 0.0.40
codegen_flags: <defaults>
</compile_context>

<pallas_src>
import jax
import jax.numpy as jnp
from jax.experimental import pallas as pl
from jax.experimental.pallas import tpu as pltpu

_LANE = 128


def _swish_kernel(x_ref, o_ref):
    x = x_ref[...]
    # Compute in f32 for sub-32-bit dtypes; exp -> EUP slot, mul -> VPU slot,
    # all hidden under the HBM DMA.
    xf = x.astype(jnp.float32) if x.dtype.itemsize < 4 else x
    o_ref[...] = (xf * jax.nn.sigmoid(xf)).astype(o_ref.dtype)


def _sublane_multiple(dtype) -> int:
    """Rows per packed vreg sublane group: 8 (f32), 16 (bf16), 32 (int8/fp8)."""
    bits = jnp.dtype(dtype).itemsize * 8
    return max(8, 256 // max(bits, 1))


def _chip_profile():
    """Per-generation tile-byte budget / VMEM limit / dual-TensorCore flag."""
    kind = ""
    try:
        kind = jax.devices()[0].device_kind.lower()
    except Exception:
        pass
    if "v7" in kind:
        # ~3.2 TB/s per TC and 64 MiB physical VMEM: big tiles + explicit
        # scoped-VMEM limit; also keep the grid shardable across both TCs.
        return {"tile_bytes": 8 << 20, "vmem_limit": 48 << 20, "dual_tc": True}
    if "v6" in kind:
        # 4 double-buffered copies of a 4 MiB tile = 16 MiB < 32 MiB default.
        return {"tile_bytes": 4 << 20, "vmem_limit": None, "dual_tc": False}
    # v5e (and unknown chips): 16 MiB default scoped VMEM -> ~2 MiB tiles.
    return {"tile_bytes": 2 << 20, "vmem_limit": None, "dual_tc": False}


def swish(x: jax.Array, *, tile_bytes: int | None = None) -> jax.Array:
    """Elementwise Swish/SiLU via a tiled Pallas TPU kernel (floating dtypes)."""
    orig_shape = x.shape
    dtype = x.dtype
    if not jnp.issubdtype(dtype, jnp.floating):
        raise TypeError(f"swish supports floating dtypes only, got {dtype}")
    n = x.size
    if n == 0:
        return x

    prof = _chip_profile()
    if tile_bytes is None:
        tile_bytes = prof["tile_bytes"]
    itemsize = jnp.dtype(dtype).itemsize
    sub = _sublane_multiple(dtype)

    x_flat = jnp.ravel(x)  # metadata-only for contiguous inputs
    pad = 0

    if n % _LANE != 0:
        if n * itemsize <= (256 << 10):
            # Small ragged input: one unblocked VMEM tile, no pad / no slice,
            # so no extra HBM passes at all.
            x2d = x_flat.reshape(1, n)
            out2d = pl.pallas_call(
                _swish_kernel,
                out_shape=jax.ShapeDtypeStruct((1, n), dtype),
                grid=(1,),
                in_specs=[pl.BlockSpec((1, n), lambda i: (0, 0))],
                out_specs=pl.BlockSpec((1, n), lambda i: (0, 0)),
            )(x2d)
            return out2d.reshape(orig_shape)
        # TODO(synk): large ragged sizes still pay 2 extra HBM passes
        # (jnp.pad + trailing slice); an in-kernel masked tail block would
        # remove them.
        pad = (-n) % _LANE
        x_flat = jnp.pad(x_flat, (0, pad))

    rows = (n + pad) // _LANE
    x2d = x_flat.reshape(rows, _LANE)

    # Byte-budgeted, dtype-aware row block (constant-byte tiles keep the DMA
    # at HBM roofline for every dtype), snapped to the packed-sublane multiple.
    br = max(sub, tile_bytes // (_LANE * itemsize))
    br = min(br, rows)
    if br < rows:
        br = max(sub, (br // sub) * sub)

    if prof["dual_tc"] and rows > sub:
        # Keep the grid step count >=2 and even (when small) so the "parallel"
        # axis can shard evenly across both v7x TensorCores.
        steps = pl.cdiv(rows, br)
        if steps == 1:
            half = pl.cdiv(rows, 2)
            br = max(sub, ((half + sub - 1) // sub) * sub)
            steps = pl.cdiv(rows, br)
        if steps < 8 and steps % 2 == 1 and steps * sub < rows:
            cand = max(sub, ((pl.cdiv(rows, steps + 1) + sub - 1) // sub) * sub)
            if pl.cdiv(rows, cand) % 2 == 0:
                br = cand

    grid = (pl.cdiv(rows, br),)

    cp_kwargs = {"dimension_semantics": ("parallel",)}
    if prof["vmem_limit"] is not None:
        cp_kwargs["vmem_limit_bytes"] = prof["vmem_limit"]

    out2d = pl.pallas_call(
        _swish_kernel,
        out_shape=jax.ShapeDtypeStruct((rows, _LANE), dtype),
        grid_spec=pltpu.PrefetchScalarGridSpec(
            num_scalar_prefetch=0,
            grid=grid,
            in_specs=[pl.BlockSpec((br, _LANE), lambda i: (i, 0))],
            out_specs=pl.BlockSpec((br, _LANE), lambda i: (i, 0)),
        ),
        compiler_params=pltpu.CompilerParams(**cp_kwargs),
    )(x2d)

    out_flat = out2d.reshape(-1)
    if pad:
        out_flat = out_flat[:n]
    return out_flat.reshape(orig_shape)


if __name__ == "__main__":
    key = jax.random.PRNGKey(0)

    # NCHW input matching the PyTorch module usage: batch=2, channels=4, 16x16.
    x = jax.random.normal(key, (2, 4, 16, 16), dtype=jnp.float32)
    y = jax.block_until_ready(swish(x))
    y_ref = x * jax.nn.sigmoid(x)
    assert y.shape == x.shape and y.dtype == x.dtype
    assert jnp.max(jnp.abs(y - y_ref)) < 1e-6

    # bf16: kernel computes in f32 internally and casts back once.
    xb = jax.random.normal(jax.random.PRNGKey(2), (2, 4, 16, 16), dtype=jnp.bfloat16)
    yb = jax.block_until_ready(swish(xb))
    xbf = xb.astype(jnp.float32)
    yb_ref = (xbf * jax.nn.sigmoid(xbf)).astype(jnp.bfloat16)
    assert yb.shape == xb.shape and yb.dtype == jnp.bfloat16
    assert jnp.max(jnp.abs(yb.astype(jnp.float32) - yb_ref.astype(jnp.float32))) < 2e-2

    # Small ragged size (n % 128 != 0): single-block path, no pad / slice.
    x2 = jax.random.normal(jax.random.PRNGKey(1), (3, 5, 7), dtype=jnp.float32)
    y2 = jax.block_until_ready(swish(x2))
    y2_ref = x2 * jax.nn.sigmoid(x2)
    assert y2.shape == x2.shape and y2.dtype == x2.dtype
    assert jnp.max(jnp.abs(y2 - y2_ref)) < 1e-6

    # Larger ragged size: padded fallback path.
    x3 = jax.random.normal(jax.random.PRNGKey(3), (513, 257), dtype=jnp.float32)
    y3 = jax.block_until_ready(swish(x3))
    y3_ref = x3 * jax.nn.sigmoid(x3)
    assert y3.shape == x3.shape and y3.dtype == x3.dtype
    assert jnp.max(jnp.abs(y3 - y3_ref)) < 1e-6

    print("KERNEL_OK")
</pallas_src>

<mosaic_0001>
module attributes {stable_mosaic.version = 11 : i64} {
  func.func @_swish_kernel(%arg0: i32, %arg1: memref<16x128xf32, #tpu.memory_space<vmem>>, %arg2: memref<16x128xf32, #tpu.memory_space<vmem>>) attributes {dimension_semantics = [#tpu.dimension_semantics<parallel>], iteration_bounds = array<i64: 1>, scalar_prefetch = 0 : i64, scratch_operands = 0 : i64, tpu.core_type = #tpu.core_type<tc>, window_params = [{transform_indices = @transform_0, window_bounds = array<i64: 16, 128>}, {transform_indices = @transform_1, window_bounds = array<i64: 16, 128>}]} {
    %c0 = arith.constant 0 : index
    %c0_0 = arith.constant 0 : index
    %0 = vector.load %arg1[%c0, %c0_0] : memref<16x128xf32, #tpu.memory_space<vmem>>, vector<16x128xf32>
    %1 = arith.negf %0 : vector<16x128xf32>
    %2 = math.exp %1 : vector<16x128xf32>
    %cst = arith.constant 1.000000e+00 : f32
    %3 = vector.broadcast %cst : f32 to vector<16x128xf32>
    %4 = arith.addf %3, %2 : vector<16x128xf32>
    %5 = arith.divf %3, %4 : vector<16x128xf32>
    %6 = arith.mulf %0, %5 : vector<16x128xf32>
    %c0_1 = arith.constant 0 : index
    %c0_2 = arith.constant 0 : index
    %7 = vector.load %arg2[%c0_1, %c0_2] : memref<16x128xf32, #tpu.memory_space<vmem>>, vector<16x128xf32>
    tpu.vector_store %arg2[%c0_1, %c0_2], %6 {strides = array<i32>} : memref<16x128xf32, #tpu.memory_space<vmem>>, vector<16x128xf32>,
    return
  }
  func.func @transform_0(%arg0: i32) -> (i32, i32) {
    %c0_i32 = arith.constant 0 : i32
    %c0_i32_0 = arith.constant 0 : i32
    return %arg0, %c0_i32 : i32, i32
  }
  func.func @transform_1(%arg0: i32) -> (i32, i32) {
    %c0_i32 = arith.constant 0 : i32
    %c0_i32_0 = arith.constant 0 : i32
    return %arg0, %c0_i32 : i32, i32
  }
}

</mosaic_0001>

<bundles_post_ra>
// kernel: tpu_custom_call.1
= control target key start
LH: loop header
LB: loop body
LE: loop exit
PB: predicated region body
PF: predicated region fallthrough
CT: control target
= control target key end

     0   :  { %6 = vsyncpa [#allocation3], 0  ;;  %s164_s0 = inlined_call_operand.hbm [shape: f32[16,128], index: 0, kind: input, shape index: {}]   ;;  %s165_s1 = inlined_call_operand.hbm [shape: f32[16,128], index: 1, kind: output, shape index: {}]  }
   0x1   :  { %7 = vsyncpa [#allocation4], 0  ;;  %s120_s6 = smov [#allocation2]   ;;  %s72_s10 = scalar_lea.hbm %s164_s0, 256 }
   0x2   :  { %s13_s7 = sshll.u32 %s120_s6, 4  ;;  %p73_p0 = scmp.ne.s32.totalorder %s164_s0, %s72_s10  ;;  %s14_s7 = int_to_ptr.vmem [resolvable:$true] %s13_s7 }
   0x3   :  { %p76_p1 = scmp.lt.u32.totalorder %s72_s10, %s164_s0 }
   0x5   :  { %p78_p2 = pnand %p76_p1, %p73_p0 }
   0x7   :  { %81 = shalt.err (!%p78_p2)
}
   0x8   :  { %s82_s15 = scalar_lea.vmem %s14_s7, 256  ;;  %p87_p4 = scmp.lt.s32.totalorder %s14_s7, %s14_s7 }
   0x9   :  { %p83_p3 = scmp.ne.s32.totalorder %s14_s7, %s82_s15  ;;  %p88_p5 = scmp.lt.s32.totalorder %s82_s15, %s82_s15 }
   0xb   :  { %p89_p6 = por %p88_p5, %p87_p4 }
   0xd   :  { %p90_p7 = pnand %p89_p6, %p83_p3 }
   0xf   :  { %93 = shalt.err (!%p90_p7)
}
  0x10   :  { %s121_s16 = smov 128   ;;  %s122_s17 = smov 8  }
  0x11   :  { %19 = dma.hbm_to_vmem [thread:$0]  %s164_s0, 256, %s14_s7, [#allocation3], %s121_s16, %s121_s16, %s122_s17  }
  0x12   :  { %116 = dma.done.wait [#allocation3], 256  }
  0x13   :  { %117 = vsyncadd [#allocation3], 4294967040  ;;  %v23_v0 = vld [vmem:[#allocation2] sm:$0xff]  ;;  %v24_v1 = vld [vmem:[#allocation2 + $0x8] sm:$0xff]  ;;  %s123_s20 = smov [#allocation5]  }
  0x14   :  { %v58_v2 = vmul.f32 -1.442695, %v23_v0  ;;  %v59_v3 = vmul.f32 -1.442695, %v24_v1  ;;  %s46_s21 = sshll.u32 %s123_s20, 4  ;;  %s47_s21 = int_to_ptr.vmem [resolvable:$true] %s46_s21 }
  0x15   :  { %s94_s0 = scalar_lea.vmem %s47_s21, 256  ;;  %p99_p9 = scmp.lt.s32.totalorder %s47_s21, %s47_s21 }
  0x16   :  { %64 = vpow2.f32 %v58_v2  ;;  %p95_p8 = scmp.ne.s32.totalorder %s47_s21, %s94_s0  ;;  %p100_p10 = scmp.lt.s32.totalorder %s94_s0, %s94_s0 }
  0x17   :  { %66 = vpow2.f32 %v59_v3 }
  0x18   :  { %p101_p11 = por %p100_p10, %p99_p9 }
  0x1a   :  { %p102_p12 = pnand %p101_p11, %p95_p8 }
  0x20   :  { %v65_v4 = vpop.eup %64 }
  0x21   :  { %v67_v5 = vpop.eup %66  ;;  %v31_v6 = vadd.f32 1.0, %v65_v4 }
  0x22   :  { %v32_v7 = vadd.f32 1.0, %v67_v5 }
  0x23   :  { %68 = vrcp.f32 %v31_v6 }
  0x24   :  { %70 = vrcp.f32 %v32_v7 }
  0x2d   :  { %v69_v8 = vpop.eup %68 }
  0x2e   :  { %v71_v9 = vpop.eup %70  ;;  %v37_v10 = vmul.f32 %v69_v8, %v23_v0 }
  0x2f   :  { %v38_v11 = vmul.f32 %v71_v9, %v24_v1 }
  0x30   :  { %39 = vst [vmem:[#allocation5] sm:$0xff] %v37_v10 }
  0x31   :  { %40 = vst [vmem:[#allocation5 + $0x8] sm:$0xff] %v38_v11 }
  0x32   :  { %105 = shalt.err (!%p102_p12)
}
  0x33   :  { %s106_s24 = scalar_lea.hbm %s165_s1, 256 }
  0x34   :  { %p107_p13 = scmp.ne.s32.totalorder %s165_s1, %s106_s24  ;;  %p110_p0 = scmp.lt.u32.totalorder %s106_s24, %s165_s1 }
  0x36   :  { %p112_p1 = pnand %p110_p0, %p107_p13 }
  0x38   :  { %115 = shalt.err (!%p112_p1)
}
  0x39   :  { %52 = dma.vmem_to_hbm [thread:$0]  %s47_s21, 256, %s165_s1, [#allocation4], %s121_s16, %s121_s16, %s122_s17  }
  0x3a   :  { %118 = dma.done.wait [#allocation4], 256  }
  0x3b   :  { %119 = vsyncadd [#allocation4], 4294967040 }
  0x3c   :  { %56 = vsyncpa [#allocation3], 1 }
  0x3d   :  { %57 = vsyncpa [#allocation4], 1 }

</bundles_post_ra>
